<compile_context>
chip_gen: v7x
topology: tpu7x:2x2x1
jax: 0.10.0
libtpu: 0.0.40
codegen_flags: <defaults>
</compile_context>

<pallas_src>
import math
import functools

import jax
import jax.numpy as jnp
from jax import lax
from jax.experimental import pallas as pl
from jax.experimental.pallas import tpu as pltpu


NEG_INF = jnp.float32(-1e30)


def attention_kernel(x_ref, wsep_ref, bsep_ref, wmul_ref, bmul_ref,
                     wres_ref, bres_ref, o_ref, *, Bt, S, D, H):
    """One grid step processes Bt batch elements (rows = Bt*S folded into M).

    x_ref : (Bt*S, D)      f32
    wsep  : (D, 3D)        bf16 ; bsep: (1, 3D)   f32
    wmul  : (3D, 3*H*D)    bf16, columns permuted to [Q_all | K_all | V_all];
                           the Q slab already carries the 1/sqrt(dk) scale.
    bmul  : (1, 3*H*D)     f32, same column order / scaling
    wres  : (H*D, D)       bf16 ; bres: (1, D)    f32
    o_ref : (Bt*S, D)      f32
    """
    HD = H * D
    rows = Bt * S

    x = x_ref[...].astype(jnp.bfloat16)

    # x = self.separate(x): bf16 MXU operands, f32 accumulation + f32 bias.
    h1 = (jnp.dot(x, wsep_ref[...], preferred_element_type=jnp.float32)
          + bsep_ref[...]).astype(jnp.bfloat16)

    # x = self.multi(x): emit the Q/K/V slabs directly as bf16 (no big f32 h2).
    def _proj(lo, hi):
        r = jnp.dot(h1, wmul_ref[:, lo:hi],
                    preferred_element_type=jnp.float32) + bmul_ref[:, lo:hi]
        return r.astype(jnp.bfloat16)

    q_all = _proj(0, HD)            # (rows, HD), pre-scaled by 1/sqrt(dk)
    k_all = _proj(HD, 2 * HD)       # (rows, HD)
    v_all = _proj(2 * HD, 3 * HD)   # (rows, HD)

    # Block-diagonal batch mask: rows of different batch elements must not
    # attend to each other.  Built once, shared across all heads.
    if Bt > 1:
        rb = lax.broadcasted_iota(jnp.int32, (rows, rows), 0) // S
        cb = lax.broadcasted_iota(jnp.int32, (rows, rows), 1) // S
        neg = jnp.where(rb == cb, jnp.float32(0.0), NEG_INF)
    else:
        neg = None

    # Per-head attention over ALL rows at once: one score matmul, one softmax,
    # one PV matmul per head.  Head outputs stay in registers and are merged
    # with a single lane-dense concatenate feeding the restore matmul.
    head_outs = []
    for h in range(H):
        c0 = h * D
        q = q_all[:, c0:c0 + D]
        k = k_all[:, c0:c0 + D]
        v = v_all[:, c0:c0 + D]

        # q @ k^T (contraction over D) without materializing a transposed tile.
        w = lax.dot_general(q, k, (((1,), (1,)), ((), ())),
                            preferred_element_type=jnp.float32)
        if neg is not None:
            w = w + neg
        m = jnp.max(w, axis=-1, keepdims=True)
        e = jnp.exp(w - m)
        denom = jnp.sum(e, axis=-1, keepdims=True)
        pv = jnp.dot(e.astype(jnp.bfloat16), v,
                     preferred_element_type=jnp.float32)
        # Deferred softmax normalization on the (rows, D) output (D <= rows),
        # denominator on the EUP approximate reciprocal.
        head_outs.append(pv * pl.reciprocal(denom, approx=True))

    a = jnp.concatenate(head_outs, axis=-1).astype(jnp.bfloat16)   # (rows, HD)

    # x = self.restore(a)
    out = jnp.dot(a, wres_ref[...],
                  preferred_element_type=jnp.float32) + bres_ref[...]
    o_ref[...] = out.astype(o_ref.dtype)

    # TODO(synk): isMask=True branch not implemented — the PyTorch code's mask
    # indexing (`mask = mask[:w.size(-2)][:w.size(-1)]`) references an
    # undefined local and is not reproducible as written.


def _qkv_column_perm(D, H):
    """new column j -> old column perm[j]: lays the `multi` output out as
    [q_h0..q_h(H-1) | k_h0..k_h(H-1) | v_h0..v_h(H-1)] (each slab H*D wide)."""
    perm = []
    for part in range(3):               # 0 = q, 1 = k, 2 = v
        for h in range(H):
            start = h * 3 * D + part * D
            perm.extend(range(start, start + D))
    return jnp.asarray(perm, dtype=jnp.int32)


def prepare_params(params):
    """One-time parameter prep (hoisted out of the steady-state forward):
    permute the `multi` columns into [Q_all|K_all|V_all] slabs, fold the
    1/sqrt(dk) attention scale into the Q slab, and cast matmul operands to
    bf16 (biases stay f32)."""
    D = params["wsep"].shape[0]
    H = params["wmul"].shape[-1] // (3 * D)
    HD = H * D
    perm = _qkv_column_perm(D, H)
    scale = 1.0 / math.sqrt(D)          # dk == word_dim in the PyTorch module
    col_scale = jnp.concatenate([jnp.full((HD,), scale, jnp.float32),
                                 jnp.ones((2 * HD,), jnp.float32)])
    wmul = params["wmul"][:, perm] * col_scale[None, :]
    bmul = params["bmul"][:, perm] * col_scale[None, :]
    return {
        "wsep": params["wsep"].astype(jnp.bfloat16),
        "bsep": params["bsep"].astype(jnp.float32),
        "wmul": wmul.astype(jnp.bfloat16),
        "bmul": bmul.astype(jnp.float32),
        "wres": params["wres"].astype(jnp.bfloat16),
        "bres": params["bres"].astype(jnp.float32),
        "D": D, "H": H,
    }


def _choose_batch_tile(B, S, row_target=256):
    """Fold batch rows into the matmul M dim.  Cap the tile near the MXU
    native row tile (~256 on v6e/v7x) so the (rows x rows) masked score matrix
    stays within tile padding, keep the (8,128) block constraint satisfied for
    non-full blocks, and prefer >=2 grid steps so a 2-TC part (v7x) can split
    the "parallel" grid axis across cores."""
    divisors = [d for d in range(1, B + 1) if B % d == 0]
    valid = [d for d in divisors if d == B or (d * S) % 8 == 0]
    fitting = [d for d in valid if d * S <= row_target]
    bt = max(fitting) if fitting else min(valid)
    if B // bt == 1:
        smaller = [d for d in valid if d < bt and d * S <= row_target]
        if smaller:
            bt = max(smaller)
    return bt


def attention_forward(x, prepped):
    """x: (B, S, D) float32.  prepped: output of prepare_params()."""
    B, S, D = x.shape
    H = prepped["H"]
    assert prepped["D"] == D

    Bt = _choose_batch_tile(B, S)
    grid = (B // Bt,)
    x2 = x.reshape(B * S, D)            # free reshape outside the kernel

    def _const_spec(arr):
        zeros = (0,) * arr.ndim
        return pl.BlockSpec(arr.shape, lambda i, z=zeros: z)

    kernel = functools.partial(attention_kernel, Bt=Bt, S=S, D=D, H=H)

    # TODO(synk): for large D/H on v7x (64 MiB VMEM) also set
    # vmem_limit_bytes and single-buffer the constant weight specs
    # (pipeline_mode=pl.Buffered(1)) / add an N-tiling axis over wmul.
    out2 = pl.pallas_call(
        kernel,
        out_shape=jax.ShapeDtypeStruct((B * S, D), x.dtype),
        grid_spec=pltpu.PrefetchScalarGridSpec(
            num_scalar_prefetch=0,
            grid=grid,
            in_specs=[
                pl.BlockSpec((Bt * S, D), lambda i: (i, 0)),
                _const_spec(prepped["wsep"]), _const_spec(prepped["bsep"]),
                _const_spec(prepped["wmul"]), _const_spec(prepped["bmul"]),
                _const_spec(prepped["wres"]), _const_spec(prepped["bres"]),
            ],
            out_specs=pl.BlockSpec((Bt * S, D), lambda i: (i, 0)),
        ),
        compiler_params=pltpu.CompilerParams(
            dimension_semantics=("parallel",)),
    )(x2, prepped["wsep"], prepped["bsep"], prepped["wmul"],
      prepped["bmul"], prepped["wres"], prepped["bres"])
    return out2.reshape(B, S, D)


def reference_forward(x, params):
    """Plain-JAX reference matching the PyTorch forward (isMask=False),
    using the ORIGINAL (unpermuted, unscaled) weights."""
    B, S, D = x.shape
    H = params["wmul"].shape[-1] // (3 * D)
    h1 = x @ params["wsep"] + params["bsep"][0]
    h2 = h1 @ params["wmul"] + params["bmul"][0]
    h2 = h2.reshape(B, S, H, 3 * D).transpose(0, 2, 1, 3)       # (B,H,S,3D)
    q, k, v = jnp.split(h2, 3, axis=-1)                         # (B,H,S,D)
    w = (q @ jnp.swapaxes(k, -1, -2)) / math.sqrt(D)
    w = jax.nn.softmax(w, axis=-1)
    a = w @ v                                                   # (B,H,S,D)
    a = a.transpose(0, 2, 1, 3).reshape(B, S, H * D)
    return a @ params["wres"] + params["bres"][0]


def make_params(key, word_dim, head_num):
    D, H = word_dim, head_num
    ks = jax.random.split(key, 6)
    scale = 0.05
    return {
        "wsep": scale * jax.random.normal(ks[0], (D, 3 * D), jnp.float32),
        "bsep": scale * jax.random.normal(ks[1], (1, 3 * D), jnp.float32),
        "wmul": scale * jax.random.normal(ks[2], (3 * D, 3 * D * H), jnp.float32),
        "bmul": scale * jax.random.normal(ks[3], (1, 3 * D * H), jnp.float32),
        "wres": scale * jax.random.normal(ks[4], (D * H, D), jnp.float32),
        "bres": scale * jax.random.normal(ks[5], (1, D), jnp.float32),
    }


if __name__ == "__main__":
    B, S, D, H = 2, 8, 32, 4          # batch, seq, word_dim, head_num
    key = jax.random.PRNGKey(0)
    kx, kp = jax.random.split(key)
    x = jax.random.normal(kx, (B, S, D), jnp.float32)
    params = make_params(kp, D, H)

    prepped = prepare_params(params)   # one-time weight prep (permute/scale/cast)
    out = attention_forward(x, prepped)
    out = jax.block_until_ready(out)

    ref = reference_forward(x, params)
    assert out.shape == (B, S, D)
    max_err = float(jnp.max(jnp.abs(out - ref)))
    # bf16 MXU inputs with f32 accumulation -> loosened tolerance vs pure f32.
    assert jnp.allclose(out, ref, atol=1e-2, rtol=1e-2), (
        f"mismatch vs reference (max abs err {max_err})")

    print("KERNEL_OK")
</pallas_src>

<mosaic_0001>
module attributes {stable_mosaic.version = 11 : i64} {
  func.func @attention_kernel(%arg0: i32, %arg1: memref<8x32xf32, #tpu.memory_space<vmem>>, %arg2: memref<32x96xbf16, #tpu.memory_space<vmem>>, %arg3: memref<1x96xf32, #tpu.memory_space<vmem>>, %arg4: memref<96x384xbf16, #tpu.memory_space<vmem>>, %arg5: memref<1x384xf32, #tpu.memory_space<vmem>>, %arg6: memref<128x32xbf16, #tpu.memory_space<vmem>>, %arg7: memref<1x32xf32, #tpu.memory_space<vmem>>, %arg8: memref<8x32xf32, #tpu.memory_space<vmem>>) attributes {dimension_semantics = [#tpu.dimension_semantics<parallel>], iteration_bounds = array<i64: 2>, scalar_prefetch = 0 : i64, scratch_operands = 0 : i64, tpu.core_type = #tpu.core_type<tc>, window_params = [{transform_indices = @transform_0, window_bounds = array<i64: 8, 32>}, {pipeline_mode = #tpu.pipeline_mode<synchronous>, transform_indices = @transform_1, window_bounds = array<i64: 32, 96>}, {pipeline_mode = #tpu.pipeline_mode<synchronous>, transform_indices = @transform_2, window_bounds = array<i64: 1, 96>}, {pipeline_mode = #tpu.pipeline_mode<synchronous>, transform_indices = @transform_3, window_bounds = array<i64: 96, 384>}, {pipeline_mode = #tpu.pipeline_mode<synchronous>, transform_indices = @transform_4, window_bounds = array<i64: 1, 384>}, {pipeline_mode = #tpu.pipeline_mode<synchronous>, transform_indices = @transform_5, window_bounds = array<i64: 128, 32>}, {pipeline_mode = #tpu.pipeline_mode<synchronous>, transform_indices = @transform_6, window_bounds = array<i64: 1, 32>}, {transform_indices = @transform_7, window_bounds = array<i64: 8, 32>}]} {
    %c0 = arith.constant 0 : index
    %c0_0 = arith.constant 0 : index
    %0 = vector.load %arg1[%c0, %c0_0] : memref<8x32xf32, #tpu.memory_space<vmem>>, vector<8x32xf32>
    %1 = arith.truncf %0 : vector<8x32xf32> to vector<8x32xbf16>
    %c0_1 = arith.constant 0 : index
    %c0_2 = arith.constant 0 : index
    %2 = vector.load %arg2[%c0_1, %c0_2] : memref<32x96xbf16, #tpu.memory_space<vmem>>, vector<32x96xbf16>
    %cst = arith.constant dense<0.000000e+00> : vector<8x96xf32>
    %3 = tpu.matmul %1, %2, %cst {dimension_numbers = #tpu.dot_dimension_numbers<[1], [0], [0], [1], [0, 0, 1, 1], [], []>} : vector<8x32xbf16>, vector<32x96xbf16>, vector<8x96xf32> -> vector<8x96xf32>
    %c0_3 = arith.constant 0 : index
    %c0_4 = arith.constant 0 : index
    %4 = vector.load %arg3[%c0_3, %c0_4] : memref<1x96xf32, #tpu.memory_space<vmem>>, vector<1x96xf32>
    %5 = vector.broadcast %4 : vector<1x96xf32> to vector<8x96xf32>
    %6 = arith.addf %3, %5 : vector<8x96xf32>
    %7 = arith.truncf %6 : vector<8x96xf32> to vector<8x96xbf16>
    %c0_5 = arith.constant 0 : index
    %c0_6 = arith.constant 0 : index
    %8 = vector.load %arg4[%c0_5, %c0_6] : memref<96x384xbf16, #tpu.memory_space<vmem>>, vector<96x128xbf16>
    %cst_7 = arith.constant dense<0.000000e+00> : vector<8x128xf32>
    %9 = tpu.matmul %7, %8, %cst_7 {dimension_numbers = #tpu.dot_dimension_numbers<[1], [0], [0], [1], [0, 0, 1, 1], [], []>} : vector<8x96xbf16>, vector<96x128xbf16>, vector<8x128xf32> -> vector<8x128xf32>
    %c0_8 = arith.constant 0 : index
    %c0_9 = arith.constant 0 : index
    %10 = vector.load %arg5[%c0_8, %c0_9] : memref<1x384xf32, #tpu.memory_space<vmem>>, vector<1x128xf32>
    %11 = vector.broadcast %10 : vector<1x128xf32> to vector<8x128xf32>
    %12 = arith.addf %9, %11 : vector<8x128xf32>
    %13 = arith.truncf %12 : vector<8x128xf32> to vector<8x128xbf16>
    %c0_10 = arith.constant 0 : index
    %c128 = arith.constant 128 : index
    %14 = vector.load %arg4[%c0_10, %c128] : memref<96x384xbf16, #tpu.memory_space<vmem>>, vector<96x128xbf16>
    %cst_11 = arith.constant dense<0.000000e+00> : vector<8x128xf32>
    %15 = tpu.matmul %7, %14, %cst_11 {dimension_numbers = #tpu.dot_dimension_numbers<[1], [0], [0], [1], [0, 0, 1, 1], [], []>} : vector<8x96xbf16>, vector<96x128xbf16>, vector<8x128xf32> -> vector<8x128xf32>
    %c0_12 = arith.constant 0 : index
    %c128_13 = arith.constant 128 : index
    %16 = vector.load %arg5[%c0_12, %c128_13] : memref<1x384xf32, #tpu.memory_space<vmem>>, vector<1x128xf32>
    %17 = vector.broadcast %16 : vector<1x128xf32> to vector<8x128xf32>
    %18 = arith.addf %15, %17 : vector<8x128xf32>
    %19 = arith.truncf %18 : vector<8x128xf32> to vector<8x128xbf16>
    %c0_14 = arith.constant 0 : index
    %c256 = arith.constant 256 : index
    %20 = vector.load %arg4[%c0_14, %c256] : memref<96x384xbf16, #tpu.memory_space<vmem>>, vector<96x128xbf16>
    %cst_15 = arith.constant dense<0.000000e+00> : vector<8x128xf32>
    %21 = tpu.matmul %7, %20, %cst_15 {dimension_numbers = #tpu.dot_dimension_numbers<[1], [0], [0], [1], [0, 0, 1, 1], [], []>} : vector<8x96xbf16>, vector<96x128xbf16>, vector<8x128xf32> -> vector<8x128xf32>
    %c0_16 = arith.constant 0 : index
    %c256_17 = arith.constant 256 : index
    %22 = vector.load %arg5[%c0_16, %c256_17] : memref<1x384xf32, #tpu.memory_space<vmem>>, vector<1x128xf32>
    %23 = vector.broadcast %22 : vector<1x128xf32> to vector<8x128xf32>
    %24 = arith.addf %21, %23 : vector<8x128xf32>
    %25 = arith.truncf %24 : vector<8x128xf32> to vector<8x128xbf16>
    %26 = vector.extract_strided_slice %13 {offsets = [0, 0], sizes = [8, 32], strides = [1, 1]} : vector<8x128xbf16> to vector<8x32xbf16>
    %27 = vector.extract_strided_slice %19 {offsets = [0, 0], sizes = [8, 32], strides = [1, 1]} : vector<8x128xbf16> to vector<8x32xbf16>
    %28 = vector.extract_strided_slice %25 {offsets = [0, 0], sizes = [8, 32], strides = [1, 1]} : vector<8x128xbf16> to vector<8x32xbf16>
    %cst_18 = arith.constant dense<0.000000e+00> : vector<8x8xf32>
    %29 = tpu.matmul %26, %27, %cst_18 {dimension_numbers = #tpu.dot_dimension_numbers<[1], [1], [0], [0], [0, 0, 1, 0], [], []>} : vector<8x32xbf16>, vector<8x32xbf16>, vector<8x8xf32> -> vector<8x8xf32>
    %cst_19 = arith.constant dense<0xFF800000> : vector<8xf32>
    %30 = vector.multi_reduction <maximumf>, %29, %cst_19 [1] : vector<8x8xf32> to vector<8xf32>
    %31 = vector.shape_cast %30 : vector<8xf32> to vector<8x1xf32>
    %32 = vector.broadcast %31 : vector<8x1xf32> to vector<8x8xf32>
    %33 = arith.subf %29, %32 : vector<8x8xf32>
    %34 = math.exp %33 : vector<8x8xf32>
    %cst_20 = arith.constant dense<0.000000e+00> : vector<8xf32>
    %35 = vector.multi_reduction <add>, %34, %cst_20 [1] : vector<8x8xf32> to vector<8xf32>
    %36 = vector.shape_cast %35 : vector<8xf32> to vector<8x1xf32>
    %37 = arith.truncf %34 : vector<8x8xf32> to vector<8x8xbf16>
    %cst_21 = arith.constant dense<0.000000e+00> : vector<8x32xf32>
    %38 = tpu.matmul %37, %28, %cst_21 {dimension_numbers = #tpu.dot_dimension_numbers<[1], [0], [0], [1], [0, 0, 1, 1], [], []>} : vector<8x8xbf16>, vector<8x32xbf16>, vector<8x32xf32> -> vector<8x32xf32>
    %39 = tpu.reciprocal %36 {approx = true} : vector<8x1xf32> -> vector<8x1xf32>
    %40 = vector.broadcast %39 : vector<8x1xf32> to vector<8x32xf32>
    %41 = arith.mulf %38, %40 : vector<8x32xf32>
    %42 = vector.extract_strided_slice %13 {offsets = [0, 32], sizes = [8, 32], strides = [1, 1]} : vector<8x128xbf16> to vector<8x32xbf16>
    %43 = vector.extract_strided_slice %19 {offsets = [0, 32], sizes = [8, 32], strides = [1, 1]} : vector<8x128xbf16> to vector<8x32xbf16>
    %44 = vector.extract_strided_slice %25 {offsets = [0, 32], sizes = [8, 32], strides = [1, 1]} : vector<8x128xbf16> to vector<8x32xbf16>
    %cst_22 = arith.constant dense<0.000000e+00> : vector<8x8xf32>
    %45 = tpu.matmul %42, %43, %cst_22 {dimension_numbers = #tpu.dot_dimension_numbers<[1], [1], [0], [0], [0, 0, 1, 0], [], []>} : vector<8x32xbf16>, vector<8x32xbf16>, vector<8x8xf32> -> vector<8x8xf32>
    %cst_23 = arith.constant dense<0xFF800000> : vector<8xf32>
    %46 = vector.multi_reduction <maximumf>, %45, %cst_23 [1] : vector<8x8xf32> to vector<8xf32>
    %47 = vector.shape_cast %46 : vector<8xf32> to vector<8x1xf32>
    %48 = vector.broadcast %47 : vector<8x1xf32> to vector<8x8xf32>
    %49 = arith.subf %45, %48 : vector<8x8xf32>
    %50 = math.exp %49 : vector<8x8xf32>
    %cst_24 = arith.constant dense<0.000000e+00> : vector<8xf32>
    %51 = vector.multi_reduction <add>, %50, %cst_24 [1] : vector<8x8xf32> to vector<8xf32>
    %52 = vector.shape_cast %51 : vector<8xf32> to vector<8x1xf32>
    %53 = arith.truncf %50 : vector<8x8xf32> to vector<8x8xbf16>
    %cst_25 = arith.constant dense<0.000000e+00> : vector<8x32xf32>
    %54 = tpu.matmul %53, %44, %cst_25 {dimension_numbers = #tpu.dot_dimension_numbers<[1], [0], [0], [1], [0, 0, 1, 1], [], []>} : vector<8x8xbf16>, vector<8x32xbf16>, vector<8x32xf32> -> vector<8x32xf32>
    %55 = tpu.reciprocal %52 {approx = true} : vector<8x1xf32> -> vector<8x1xf32>
    %56 = vector.broadcast %55 : vector<8x1xf32> to vector<8x32xf32>
    %57 = arith.mulf %54, %56 : vector<8x32xf32>
    %58 = vector.extract_strided_slice %13 {offsets = [0, 64], sizes = [8, 32], strides = [1, 1]} : vector<8x128xbf16> to vector<8x32xbf16>
    %59 = vector.extract_strided_slice %19 {offsets = [0, 64], sizes = [8, 32], strides = [1, 1]} : vector<8x128xbf16> to vector<8x32xbf16>
    %60 = vector.extract_strided_slice %25 {offsets = [0, 64], sizes = [8, 32], strides = [1, 1]} : vector<8x128xbf16> to vector<8x32xbf16>
    %cst_26 = arith.constant dense<0.000000e+00> : vector<8x8xf32>
    %61 = tpu.matmul %58, %59, %cst_26 {dimension_numbers = #tpu.dot_dimension_numbers<[1], [1], [0], [0], [0, 0, 1, 0], [], []>} : vector<8x32xbf16>, vector<8x32xbf16>, vector<8x8xf32> -> vector<8x8xf32>
    %cst_27 = arith.constant dense<0xFF800000> : vector<8xf32>
    %62 = vector.multi_reduction <maximumf>, %61, %cst_27 [1] : vector<8x8xf32> to vector<8xf32>
    %63 = vector.shape_cast %62 : vector<8xf32> to vector<8x1xf32>
    %64 = vector.broadcast %63 : vector<8x1xf32> to vector<8x8xf32>
    %65 = arith.subf %61, %64 : vector<8x8xf32>
    %66 = math.exp %65 : vector<8x8xf32>
    %cst_28 = arith.constant dense<0.000000e+00> : vector<8xf32>
    %67 = vector.multi_reduction <add>, %66, %cst_28 [1] : vector<8x8xf32> to vector<8xf32>
    %68 = vector.shape_cast %67 : vector<8xf32> to vector<8x1xf32>
    %69 = arith.truncf %66 : vector<8x8xf32> to vector<8x8xbf16>
    %cst_29 = arith.constant dense<0.000000e+00> : vector<8x32xf32>
    %70 = tpu.matmul %69, %60, %cst_29 {dimension_numbers = #tpu.dot_dimension_numbers<[1], [0], [0], [1], [0, 0, 1, 1], [], []>} : vector<8x8xbf16>, vector<8x32xbf16>, vector<8x32xf32> -> vector<8x32xf32>
    %71 = tpu.reciprocal %68 {approx = true} : vector<8x1xf32> -> vector<8x1xf32>
    %72 = vector.broadcast %71 : vector<8x1xf32> to vector<8x32xf32>
    %73 = arith.mulf %70, %72 : vector<8x32xf32>
    %74 = vector.extract_strided_slice %13 {offsets = [0, 96], sizes = [8, 32], strides = [1, 1]} : vector<8x128xbf16> to vector<8x32xbf16>
    %75 = vector.extract_strided_slice %19 {offsets = [0, 96], sizes = [8, 32], strides = [1, 1]} : vector<8x128xbf16> to vector<8x32xbf16>
    %76 = vector.extract_strided_slice %25 {offsets = [0, 96], sizes = [8, 32], strides = [1, 1]} : vector<8x128xbf16> to vector<8x32xbf16>
    %cst_30 = arith.constant dense<0.000000e+00> : vector<8x8xf32>
    %77 = tpu.matmul %74, %75, %cst_30 {dimension_numbers = #tpu.dot_dimension_numbers<[1], [1], [0], [0], [0, 0, 1, 0], [], []>} : vector<8x32xbf16>, vector<8x32xbf16>, vector<8x8xf32> -> vector<8x8xf32>
    %cst_31 = arith.constant dense<0xFF800000> : vector<8xf32>
    %78 = vector.multi_reduction <maximumf>, %77, %cst_31 [1] : vector<8x8xf32> to vector<8xf32>
    %79 = vector.shape_cast %78 : vector<8xf32> to vector<8x1xf32>
    %80 = vector.broadcast %79 : vector<8x1xf32> to vector<8x8xf32>
    %81 = arith.subf %77, %80 : vector<8x8xf32>
    %82 = math.exp %81 : vector<8x8xf32>
    %cst_32 = arith.constant dense<0.000000e+00> : vector<8xf32>
    %83 = vector.multi_reduction <add>, %82, %cst_32 [1] : vector<8x8xf32> to vector<8xf32>
    %84 = vector.shape_cast %83 : vector<8xf32> to vector<8x1xf32>
    %85 = arith.truncf %82 : vector<8x8xf32> to vector<8x8xbf16>
    %cst_33 = arith.constant dense<0.000000e+00> : vector<8x32xf32>
    %86 = tpu.matmul %85, %76, %cst_33 {dimension_numbers = #tpu.dot_dimension_numbers<[1], [0], [0], [1], [0, 0, 1, 1], [], []>} : vector<8x8xbf16>, vector<8x32xbf16>, vector<8x32xf32> -> vector<8x32xf32>
    %87 = tpu.reciprocal %84 {approx = true} : vector<8x1xf32> -> vector<8x1xf32>
    %88 = vector.broadcast %87 : vector<8x1xf32> to vector<8x32xf32>
    %89 = arith.mulf %86, %88 : vector<8x32xf32>
    %90 = tpu.concatenate %41, %57, %73, %89 in 1 : vector<8x32xf32>, vector<8x32xf32>, vector<8x32xf32>, vector<8x32xf32> -> vector<8x128xf32>
    %91 = arith.truncf %90 : vector<8x128xf32> to vector<8x128xbf16>
    %c0_34 = arith.constant 0 : index
    %c0_35 = arith.constant 0 : index
    %92 = vector.load %arg6[%c0_34, %c0_35] : memref<128x32xbf16, #tpu.memory_space<vmem>>, vector<128x32xbf16>
    %cst_36 = arith.constant dense<0.000000e+00> : vector<8x32xf32>
    %93 = tpu.matmul %91, %92, %cst_36 {dimension_numbers = #tpu.dot_dimension_numbers<[1], [0], [0], [1], [0, 0, 1, 1], [], []>} : vector<8x128xbf16>, vector<128x32xbf16>, vector<8x32xf32> -> vector<8x32xf32>
    %c0_37 = arith.constant 0 : index
    %c0_38 = arith.constant 0 : index
    %94 = vector.load %arg7[%c0_37, %c0_38] : memref<1x32xf32, #tpu.memory_space<vmem>>, vector<1x32xf32>
    %95 = vector.broadcast %94 : vector<1x32xf32> to vector<8x32xf32>
    %96 = arith.addf %93, %95 : vector<8x32xf32>
    %c0_39 = arith.constant 0 : index
    %c0_40 = arith.constant 0 : index
    %97 = vector.load %arg8[%c0_39, %c0_40] : memref<8x32xf32, #tpu.memory_space<vmem>>, vector<8x32xf32>
    tpu.vector_store %arg8[%c0_39, %c0_40], %96 {strides = array<i32>} : memref<8x32xf32, #tpu.memory_space<vmem>>, vector<8x32xf32>,
    return
  }
  func.func @transform_0(%arg0: i32) -> (i32, i32) {
    %c0_i32 = arith.constant 0 : i32
    %c0_i32_0 = arith.constant 0 : i32
    return %arg0, %c0_i32 : i32, i32
  }
  func.func @transform_1(%arg0: i32) -> (i32, i32) {
    %c0_i32 = arith.constant 0 : i32
    %c0_i32_0 = arith.constant 0 : i32
    %c0_i32_1 = arith.constant 0 : i32
    return %c0_i32, %c0_i32_0 : i32, i32
  }
  func.func @transform_2(%arg0: i32) -> (i32, i32) {
    %c0_i32 = arith.constant 0 : i32
    %c0_i32_0 = arith.constant 0 : i32
    %c0_i32_1 = arith.constant 0 : i32
    return %c0_i32, %c0_i32_0 : i32, i32
  }
  func.func @transform_3(%arg0: i32) -> (i32, i32) {
    %c0_i32 = arith.constant 0 : i32
    %c0_i32_0 = arith.constant 0 : i32
    %c0_i32_1 = arith.constant 0 : i32
    return %c0_i32, %c0_i32_0 : i32, i32
  }
  func.func @transform_4(%arg0: i32) -> (i32, i32) {
    %c0_i32 = arith.constant 0 : i32
    %c0_i32_0 = arith.constant 0 : i32
    %c0_i32_1 = arith.constant 0 : i32
    return %c0_i32, %c0_i32_0 : i32, i32
  }
  func.func @transform_5(%arg0: i32) -> (i32, i32) {
    %c0_i32 = arith.constant 0 : i32
    %c0_i32_0 = arith.constant 0 : i32
    %c0_i32_1 = arith.constant 0 : i32
    return %c0_i32, %c0_i32_0 : i32, i32
  }
  func.func @transform_6(%arg0: i32) -> (i32, i32) {
    %c0_i32 = arith.constant 0 : i32
    %c0_i32_0 = arith.constant 0 : i32
    %c0_i32_1 = arith.constant 0 : i32
    return %c0_i32, %c0_i32_0 : i32, i32
  }
  func.func @transform_7(%arg0: i32) -> (i32, i32) {
    %c0_i32 = arith.constant 0 : i32
    %c0_i32_0 = arith.constant 0 : i32
    return %arg0, %c0_i32 : i32, i32
  }
}

</mosaic_0001>

<bundles_post_ra>
// kernel: tpu_custom_call.1
= control target key start
LH: loop header
LB: loop body
LE: loop exit
PB: predicated region body
PF: predicated region fallthrough
CT: control target
= control target key end

     0   :  { %12 = vsyncpa [#allocation3], 0  ;;  %s2080_s0 = inlined_call_operand.vmem [shape: f32[16,32], index: 0, kind: input, shape index: {}]   ;;  %s2081_s1 = inlined_call_operand.vmem [shape: bf16[32,96], index: 1, kind: input, shape index: {}]   ;;  %s2082_s2 = inlined_call_operand.vmem [shape: f32[1,96], index: 2, kind: input, shape index: {}]   ;;  %s2083_s3 = inlined_call_operand.hbm [shape: bf16[96,384], index: 3, kind: input, shape index: {}]   ;;  %s2084_s4 = inlined_call_operand.vmem [shape: f32[1,384], index: 4, kind: input, shape index: {}]   ;;  %s2085_s5 = inlined_call_operand.vmem [shape: bf16[128,32], index: 5, kind: input, shape index: {}]   ;;  %s2086_s6 = inlined_call_operand.vmem [shape: f32[1,32], index: 6, kind: input, shape index: {}]   ;;  %s2087_s7 = inlined_call_operand.hbm [shape: f32[16,32], index: 7, kind: output, shape index: {}]  }
   0x1   :  { %13 = vsyncpa [#allocation4], 0 }
   0x2   :  { %15 = vsyncpa [#allocation4 + $0x1], 0  ;;  %s1781_s24 = smov 0   ;;  %s1783_s25 = smov 0  }
   0x3   :  { %s1785_s26 = smov 0   ;;  %s1787_s27 = smov 0  }
   0x4 LB: > { %s1802_s28 = sadd.s32 4294967295, %s1730_s27   ;;  %s1305_s29 = sadd.s32 4294967294, %s1730_s27   ;;  %s1730_s27 = sphi %s1787_s27, %s2103_s27   ;;  %s1726_s26 = sphi %s1785_s26, %s2102_s26   ;;  %s1722_s25 = sphi %s1783_s25, %s2101_s25   ;;  %s1718_s24 = sphi %s1781_s24, %s2100_s24  }
   0x5   : > { %s1806_s30 = sadd.s32 1, %s1730_s27   ;;  %s180_s8 = sadd.s32 1, %s1726_s26 }
   0x6   : > { %s177_s9 = ssub.s32 %s1730_s27, %s1806_s30  ;;  %p190_p0 = scmp.ne.s32.totalorder %s1726_s26, %s1722_s25 }
   0x7   : > { %p178_p1 = scmp.eq.s32.totalorder %s177_s9, 0  ;;  %p191_p2 = scmp.eq.s32.totalorder %s1802_s28, 1 }
   0x8   : > { %p196_p3 = scmp.ne.s32.totalorder %s1722_s25, %s1718_s24  ;;  %p197_p4 = scmp.eq.s32.totalorder %s1305_s29, 1 }
   0x9   : > { %s1817_s10 = scalar_select %p178_p1, %s1726_s26, %s180_s8  }
   0xa   : > { %p1819_p5 = por %p191_p2, %p190_p0  ;;  %p1823_p6 = por %p197_p4, %p196_p3 }
   0xb   : > { %p1306_p7 = scmp.ge.s32.totalorder %s1730_s27, 1  ;;  %p204_p8 = scmp.lt.s32.totalorder %s1730_s27, 3 }
   0xc   : > { %s2091_s11 = scalar_select %p1819_p5, 1, 0 }
   0xd   : > { %s2092_s12 = scalar_select %p1823_p6, 1, 0 }
   0xe   : > { %p2088_p9 = scmp.eq.s32.totalorder %s1802_s28, 0  ;;  %p1830_p10 = pnand %p1306_p7, %p204_p8 }
   0xf   : > { %s1732_s14 = smov [#allocation2]   ;;  %s1636_s19 = scalar_lea.hbm %s2083_s3, 2304 }
  0x10   : > { %s2093_s13 = scalar_select %p1830_p10, 1, 0 }
  0x11   : > { %s222_s15 = sshll.u32 %s1732_s14, 4  ;;  %p1541_p11 = pneg %p1830_p10  ;;  %s223_s15 = int_to_ptr.vmem [resolvable:$true] %s222_s15 }
  0x12   : > { %p1637_p13 = scmp.ne.s32.totalorder %s2083_s3, %s1636_s19  ;;  %p1643_p3 = scmp.lt.u32.totalorder %s1636_s19, %s2083_s3 }
  0x13   : > { %p1838_p12 = pnand %p2088_p9, %p1541_p11 }
  0x15   : > { %p1638_p0 = pneg %p1838_p12 }
  0x17   : > { %p1639_p1 = pnand %p1638_p0, %p1637_p13 }
  0x19   : > { %p1640_p2 = pneg %p1639_p1 }
  0x1b   : > { %p1645_p4 = pnand %p1643_p3, %p1640_p2 }
  0x1d   : > { %1648 = shalt.err (!%p1645_p4)
}
  0x1e   : > { %s1649_s29 = scalar_lea.vmem %s223_s15, 2304  ;;  %p1657_p9 = scmp.lt.s32.totalorder %s223_s15, %s223_s15 }
  0x1f   : > { %p1650_p7 = scmp.ne.s32.totalorder %s223_s15, %s1649_s29  ;;  %p1658_p6 = scmp.lt.s32.totalorder %s1649_s29, %s1649_s29 }
  0x21   : > { %p1652_p8 = pnand %p1650_p7, %p1638_p0  ;;  %p1659_p5 = por %p1658_p6, %p1657_p9 }
  0x23   : > { %p1653_p11 = pneg %p1652_p8 }
  0x25   : > { %p1660_p10 = pnand %p1659_p5, %p1653_p11 }
  0x27   : > { %1663 = shalt.err (!%p1660_p10)
}
  0x28   : > { %s1733_s8 = smov 192   ;;  %s1734_s9 = smov 12  }
  0x29   : > { %1544 = dma.hbm_to_vmem [thread:$0]  (!%p1838_p12), %s2083_s3, 2304, %s223_s15, [#allocation3], %s1733_s8, %s1733_s8, %s1734_s9  }
  0x2a   : > { %p2095_p13 = scmp.ne.s32.totalorder %s2093_s13, 0 }
  0x2b   : > { %p2096_p1 = scmp.eq.s32.totalorder (!%p2095_p13), %s1802_s28, 0 }
  0x2c   : > { %254 = sbr.rel (%p2095_p13) target bundleno = 1867 (0x74b), region = 48 }
  0x33   : > { %1709 = dma.done.wait (%p2096_p1), [#allocation3], 2304   ;;  %p2097_p0 = pmov %p2096_p1 }
  0x34   : > { %p285_p5 = scmp.lt.s32.totalorder %s1802_s28, 1  ;;  %v1735_v0 = vmov 0.0   ;;  %vm1736_vm0 = vmmov 0   ;;  %v1592_v1 = vld [vmem:[%s2081_s1] sm:$0xff]   ;;  %v1593_v2 = vld [vmem:[%s2081_s1 + $0x8] sm:$0xff]   ;;  %vm315_vm1 = vcmask 261120  }
  0x35   : > { %1711 = vsyncadd (%p2097_p0), [#allocation3], 4294964992  ;;  %1411 = vmatprep.subr.bf16.mxu1 %v1735_v0  ;;  %1415 = vmatprep.mubr.msk.bf16.mxu1 %vm1736_vm0, %v1735_v0  ;;  %v1595_v4 = vld [vmem:[#allocation2 + $0x4] ss:$12 sps:$4 sm:$0xff]   ;;  %v1594_v6 = vld [vmem:[#allocation2] ss:$12 sps:$4 sm:$0xff]  }
  0x36   : > { %s286_s15 = scalar_select %p285_p5, %s1802_s28, 1  ;;  %1435 = vmatprep.subr.bf16.mxu0 %v1735_v0  ;;  %1447 = vmatprep.mubr.msk.bf16.mxu0 %vm1736_vm0, %v1735_v0  ;;  %v1597_v7 = vld [vmem:[#allocation2 + $0x1c] ss:$12 sps:$4 sm:$0xff]   ;;  %v1596_v8 = vld [vmem:[#allocation2 + $0x18] ss:$12 sps:$4 sm:$0xff]   ;;  %vm415_vm2 = vcmask 785408  }
  0x37   : > { %1412 = vmatpush3.bf16.msra.mxu1 %v1592_v1  ;;  %1436 = vmatpush3.bf16.msra.mxu0 %v1595_v4  ;;  %v1599_v9 = vld [vmem:[#allocation2 + $0x34] ss:$12 sps:$4 sm:$0xff]   ;;  %v1598_v10 = vld [vmem:[#allocation2 + $0x30] ss:$12 sps:$4 sm:$0xff]   ;;  %v1601_v11 = vld [vmem:[#allocation2 + $0x4c] ss:$12 sps:$4 sm:$0xff]  }
  0x38   : > { %s1312_s13 = sshll.u32 %s286_s15, 3  ;;  %1413 = vmatprep.subr.bf16.mxu1 %v1735_v0  ;;  %1437 = vmatprep.subr.bf16.mxu0 %v1735_v0  ;;  %v1600_v12 = vld [vmem:[#allocation2 + $0x48] ss:$12 sps:$4 sm:$0xff]   ;;  %v1603_v13 = vld [vmem:[#allocation2 + $0x64] ss:$12 sps:$4 sm:$0xff]   ;;  %s1738_s16 = smov 64  }
  0x39   : > { %s288_s19 = scalar_lea.vmem %s2080_s0, %s1312_s13  ;;  %v1602_v14 = vld [vmem:[#allocation2 + $0x60] ss:$12 sps:$4 sm:$0xff]   ;;  %v1604_v15 = vld [vmem:[#allocation2 + $0x78] ss:$12 sps:$4 sm:$0xff]   ;;  %v1605_v16 = vld [vmem:[#allocation2 + $0x7c] ss:$12 sps:$4 sm:$0xff]  }
  0x3a   : > { %v290_v3 = vld [vmem:[%s288_s19] sm:$0xff]  ;;  %v1606_v22 = vld [vmem:[#allocation2 + $0x8] ss:$12 sps:$4 sm:$0xff]   ;;  %v1609_v27 = vld [vmem:[#allocation2 + $0x50] ss:$12 sps:$4 sm:$0xff]   ;;  %s1737_s13 = smov 96  }
  0x3b   : > { %v291_v5 = vpack.c.bf16 %v290_v3, %v290_v3  ;;  %1414 = vmatpush3.bf16.msra.mxu1 %v1593_v2  ;;  %1438 = vmatpush3.bf16.msra.mxu0 %v1597_v7  ;;  %v1313_v17 = vld [vmem:[%s2082_s2] ss:$0 sm:$0xff]  ;;  %v1608_v26 = vld [vmem:[#allocation2 + $0x38] ss:$12 sps:$4 sm:$0xff]   ;;  %v1610_v28 = vld [vmem:[#allocation2 + $0x68] ss:$12 sps:$4 sm:$0xff]  }
  0x3c   : > { %1419 = vmatprep.subr.bf16.mxu1 %v1735_v0  ;;  %1439 = vmatprep.subr.bf16.mxu0 %v1735_v0  ;;  %v1607_v25 = vld [vmem:[#allocation2 + $0x20] ss:$12 sps:$4 sm:$0xff]   ;;  %s1739_s18 = smov 32   ;;  %vm712_vm3 = vcmask 1043456   ;;  %vm698_vm4 = vcmask 64512   ;;  %vm1104_vm5 = vcmask 523264  }
  0x3d   : > { %v1611_v29 = vld [vmem:[#allocation2 + $0x80] ss:$12 sps:$4 sm:$0xff]   ;;  %s282_s29 = sand.u32 1, %s1722_s25   ;;  %s1359_s14 = sshll.u32 %s1802_s28, 7 }
  0x3e   : > { %1416 = vmatmul.mubr.msk.bf16.vlgmr.msra.gmra.mrb[0].mxu1 %vm315_vm1, %v291_v5  ;;  %v1317_v30 = vld [vmem:[%s2084_s4] ss:$0 sm:$0xff]  ;;  %v1325_v31 = vld [vmem:[%s2084_s4 + $0x1] ss:$0 sm:$0xff]  ;;  %v1333_v45 = vld [vmem:[%s2084_s4 + $0x2] ss:$0 sm:$0xff]  ;;  %s2037_s20 = scalar_lea.hbm %s2087_s7, %s1359_s14 }
  0x3f   : > { %1420 = vmatpush3.bf16.msra.mxu1 %v1594_v6  ;;  %1431 = vmatprep.mubr.msk.bf16.mxu1 %vm1736_vm0, %v1735_v0  ;;  %s1221_s28 = scalar_lea.sflag [#allocation4], %s282_s29  ;;  %p2098_p9 = scmp.ne.s32.totalorder %s2091_s11, 0 }
  0x40   : > { %1421 = vmatprep.subr.bf16.mxu1 %v1735_v0  ;;  %1440 = vmatpush3.bf16.msra.mxu0 %v1599_v9  ;;  %s1740_s22 = smov [#allocation5]  }
  0x41   : > { %1441 = vmatprep.subr.bf16.mxu0 %v1735_v0 }
  0x43   : > { %1422 = vmatpush3.bf16.msra.mxu1 %v1596_v8 }
  0x44   : > { %1423 = vmatprep.subr.bf16.mxu1 %v1735_v0  ;;  %1442 = vmatpush3.bf16.msra.mxu0 %v1601_v11 }
  0x45   : > { %1443 = vmatprep.subr.bf16.mxu0 %v1735_v0 }
  0x47   : > { %1424 = vmatpush3.bf16.msra.mxu1 %v1598_v10 }
  0x48   : > { %1425 = vmatprep.subr.bf16.mxu1 %v1735_v0  ;;  %1444 = vmatpush3.bf16.msra.mxu0 %v1603_v13 }
  0x49   : > { %1445 = vmatprep.subr.bf16.mxu0 %v1735_v0 }
  0x4b   : > { %1426 = vmatpush3.bf16.msra.mxu1 %v1600_v12 }
  0x4c   : > { %1427 = vmatprep.subr.bf16.mxu1 %v1735_v0  ;;  %1446 = vmatpush3.bf16.msra.mxu0 %v1605_v16 }
  0x4d   : > { %1473 = vmatprep.subr.bf16.mxu0 %v1735_v0 }
  0x4f   : > { %1428 = vmatpush3.bf16.msra.mxu1 %v1602_v14 }
  0x50   : > { %1429 = vmatprep.subr.bf16.mxu1 %v1735_v0 }
  0x53   : > { %1430 = vmatpush3.bf16.msra.mxu1 %v1604_v15 }
  0x54   : > { %1451 = vmatprep.subr.bf16.mxu1 %v1735_v0 }
 0x111   : > { %v353_v18 = vpop.f32.mrb[0].mxu1 }
 0x112   : > { %v354_v19 = vadd.f32 %v1313_v17, %v353_v18  ;;  %v1417_v20 = vpop.f32.mrb[1].mxu1 }
 0x113   : > { %v356_v21 = vpop.f32.mrb[2].mxu1 }
 0x114   : > { %v359_v23 = vpack.c.bf16 %v354_v19, %v354_v19  ;;  %v1418_v24 = vpop.f32.mrb[3].mxu1 }
 0x116   : > { %1432 = vmatmul.mubr.msk.bf16.vlgmr.msra.gmra.mrb[4].mxu1 %vm415_vm2, %v359_v23  ;;  %1448 = vmatmul.mubr.msk.bf16.vlgmr.msra.gmra.mrb[0].mxu0 %vm415_vm2, %v359_v23 }
 0x117   : > { %1452 = vmatpush3.bf16.msra.mxu1 %v1606_v22  ;;  %1463 = vmatprep.mubr.msk.bf16.mxu1 %vm1736_vm0, %v1735_v0 }
 0x118   : > { %1453 = vmatprep.subr.bf16.mxu1 %v1735_v0  ;;  %1475 = vmatprep.mubr.msk.bf16.mxu0 %vm1736_vm0, %v1735_v0 }
 0x11b   : > { %1454 = vmatpush3.bf16.msra.mxu1 %v1607_v25 }
 0x11c   : > { %1455 = vmatprep.subr.bf16.mxu1 %v1735_v0 }
 0x11f   : > { %1456 = vmatpush3.bf16.msra.mxu1 %v1608_v26 }
 0x120   : > { %1457 = vmatprep.subr.bf16.mxu1 %v1735_v0 }
 0x123   : > { %1458 = vmatpush3.bf16.msra.mxu1 %v1609_v27 }
 0x124   : > { %1459 = vmatprep.subr.bf16.mxu1 %v1735_v0 }
 0x127   : > { %1460 = vmatpush3.bf16.msra.mxu1 %v1610_v28 }
 0x128   : > { %1461 = vmatprep.subr.bf16.mxu1 %v1735_v0 }
 0x12b   : > { %1462 = vmatpush3.bf16.msra.mxu1 %v1611_v29 }
 0x12c   : > { %1467 = vmatprep.subr.bf16.mxu1 %v1735_v0 }
 0x12e   : > { %1464 = vmatmul.mubr.msk.bf16.vlgmr.msra.gmra.mrb[8].mxu1 %vm415_vm2, %v359_v23 }
 0x12f   : > { %1469 = vmatprep.mubr.msk.bf16.mxu1 %vm1736_vm0, %v1735_v0 }
 0x1e9   : > { %v453_v32 = vpop.f32.mrb[4].mxu1  ;;  %v549_v33 = vpop.f32.mrb[0].mxu0 }
 0x1ea   : > { %v454_v34 = vadd.f32 %v1317_v30, %v453_v32  ;;  %v550_v35 = vadd.f32 %v1325_v31, %v549_v33  ;;  %v1433_v36 = vpop.f32.mrb[5].mxu1  ;;  %v1449_v37 = vpop.f32.mrb[1].mxu0 }
 0x1eb   : > { %v456_v38 = vpop.f32.mrb[6].mxu1  ;;  %v552_v39 = vpop.f32.mrb[2].mxu0 }
 0x1ec   : > { %v459_v40 = vpack.c.bf16 %v454_v34, %v454_v34  ;;  %v555_v41 = vpack.c.bf16 %v550_v35, %v550_v35  ;;  %v1434_v42 = vpop.f32.mrb[7].mxu1  ;;  %v1450_v43 = vpop.f32.mrb[3].mxu0 }
 0x1ee   : > { %759 = vrot.lane.b32.xlu1 %v459_v40, %s1737_s13  ;;  %v656_v44 = vsel %vm315_vm1, %v555_v41, 0 }
 0x1ef   : > { %1468 = vmatpush3.bf16.xpose.msra.mxu1 %v656_v44 }
 0x1f0   : > { %1485 = vmatprep.subr.bf16.mxu1 %v1735_v0 }
 0x1f2   : > { %873 = vrot.lane.b32.xlu1 %v555_v41, %s1738_s16 }
 0x1f6   : > { %871 = vrot.lane.b32.xlu1 %v459_v40, %s1738_s16  ;;  %1470 = vmatmul.mubr.msk.bf16.vlgmr.msra.gmra.mrb[12].mxu1 %vm315_vm1, %v459_v40 }
 0x1f7   : > { %1487 = vmatprep.mubr.msk.bf16.mxu1 %vm1736_vm0, %v1735_v0 }
 0x1fa   : > { %983 = vrot.lane.b32.xlu1 %v555_v41, %s1739_s18 }
 0x1fe   : > { %981 = vrot.lane.b32.xlu1 %v459_v40, %s1739_s18 }
 0x201   : > { %v645_v46 = vpop.f32.mrb[8].mxu1 }
 0x202   : > { %v646_v47 = vadd.f32 %v1333_v45, %v645_v46  ;;  %v1465_v48 = vpop.f32.mrb[9].mxu1 }
 0x203   : > { %v648_v49 = vpop.f32.mrb[10].mxu1 }
 0x204   : > { %v1935_v50 = vpack.c.bf16 %v646_v47, %v646_v47  ;;  %v1466_v51 = vpop.f32.mrb[11].mxu1 }
 0x206   : > { %v714_v52 = vsel %vm712_vm3, %v1935_v50, 0 }
 0x207   : > { %1474 = vmatpush3.bf16.msra.mxu0 %v714_v52 }
 0x208   : > { %1479 = vmatprep.subr.bf16.mxu0 %v1735_v0 }
 0x260   : > { %v760_v61 = vpop.permute.xlu1 %759 }
 0x264   : > { %v874_v3 = vpop.permute.xlu1 %873 }
 0x265   : > { %v879_v5 = vsel %vm315_vm1, %v874_v3, 0  ;;  %v1615_v3 = vld [vmem:[%s2085_s5 + $0x18] sm:$0xff]  }
 0x268   : > { %v872_v4 = vpop.permute.xlu1 %871 }
 0x26c   : > { %v984_v6 = vpop.permute.xlu1 %983 }
 0x26d   : > { %v989_v7 = vsel %vm315_vm1, %v984_v6, 0 }
 0x270   : > { %v982_v8 = vpop.permute.xlu1 %981 }
 0x2c9   : > { %v692_v53 = vpop.f32.mrb[12].mxu1 }
 0x2ca   : > { %v1471_v54 = vpop.f32.mrb[13].mxu1  ;;  %v699_v55 = vsel %vm698_vm4, %v692_v53, -inf }
 0x2cb   : > { %700 = vmax.xlane.f32.xlu0 %v699_v55  ;;  %v695_v56 = vpop.f32.mrb[14].mxu1  ;;  %v1612_v55 = vld [vmem:[%s2085_s5] sm:$0xff]  }
 0x2cc   : > { %v1472_v57 = vpop.f32.mrb[15].mxu1 }
 0x2e1   : > { %762 = vrot.lane.b32.xlu0 %v555_v41, %s1737_s13 }
 0x358   : > { %v701_v58 = vpop.xlane.xlu0 %700 }
 0x359   : > { %v702_v59 = vsub.f32 %v692_v53, %v701_v58  ;;  %v1613_v58 = vld [vmem:[%s2085_s5 + $0x8] sm:$0xff]  }
 0x35b   : > { %v703_v60 = vmul.f32 1.442695, %v702_v59 }
 0x35c   : > { %v763_v63 = vpop.permute.xlu0 %762 }
 0x35d   : > { %1620 = vpow2.f32 %v703_v60  ;;  %v768_v2 = vsel %vm315_vm1, %v763_v63, 0  ;;  %v1614_v63 = vld [vmem:[%s2085_s5 + $0x10] sm:$0xff]  }
 0x367   : > { %v1942_v62 = vpop.eup %1620 }
 0x368   : > { %v708_v1 = vpack.c.bf16 %v1942_v62, %v1942_v62  ;;  %v705_v52 = vsel %vm698_vm4, %v1942_v62, 0.0 }
 0x36a   : > { %1476 = vmatmul.mubr.msk.bf16.vlgmr.msra.gmra.mrb[4].mxu0 %vm698_vm4, %v708_v1 }
 0x36b   : > { %1480 = vmatpush3.bf16.xpose.msra.mxu0 %v768_v2  ;;  %1481 = vmatprep.mubr.msk.bf16.mxu0 %vm1736_vm0, %v1735_v0 }
 0x36c   : > { %1491 = vmatprep.subr.bf16.mxu0 %v1735_v0 }
 0x372   : > { %1482 = vmatmul.mubr.msk.bf16.vlgmr.msra.gmra.mrb[8].mxu0 %vm315_vm1, %v760_v61 }
 0x373   : > { %1492 = vmatpush3.bf16.xpose.msra.mxu0 %v879_v5  ;;  %1493 = vmatprep.mubr.msk.bf16.mxu0 %vm1736_vm0, %v1735_v0 }
 0x374   : > { %1503 = vmatprep.subr.bf16.mxu0 %v1735_v0 }
 0x37a   : > { %1494 = vmatmul.mubr.msk.bf16.vlgmr.msra.gmra.mrb[12].mxu0 %vm315_vm1, %v872_v4 }
 0x37b   : > { %1504 = vmatpush3.bf16.xpose.msra.mxu0 %v989_v7  ;;  %1505 = vmatprep.mubr.msk.bf16.mxu0 %vm1736_vm0, %v1735_v0 }
 0x37c   : > { %1515 = vmatprep.subr.bf16.mxu0 %v1735_v0 }
 0x382   : > { %1506 = vmatmul.mubr.msk.bf16.vlgmr.msra.gmra.mrb[16].mxu0 %vm315_vm1, %v982_v8  ;;  %v1616_v8 = vld [vmem:[%s2085_s5 + $0x20] sm:$0xff]  }
 0x383   : > { %1531 = vmatprep.mubr.msk.bf16.mxu0 %vm1736_vm0, %v1735_v0  ;;  %1516 = vmatpush3.bf16.msra.mxu0 %v1612_v55 }
 0x384   : > { %1517 = vmatprep.subr.bf16.mxu0 %v1735_v0 }
 0x387   : > { %1518 = vmatpush3.bf16.msra.mxu0 %v1613_v58 }
 0x388   : > { %1519 = vmatprep.subr.bf16.mxu0 %v1735_v0 }
 0x38b   : > { %1520 = vmatpush3.bf16.msra.mxu0 %v1614_v63 }
 0x38c   : > { %1521 = vmatprep.subr.bf16.mxu0 %v1735_v0 }
 0x38f   : > { %1522 = vmatpush3.bf16.msra.mxu0 %v1615_v3 }
 0x390   : > { %1523 = vmatprep.subr.bf16.mxu0 %v1735_v0 }
 0x393   : > { %1524 = vmatpush3.bf16.msra.mxu0 %v1616_v8 }
 0x394   : > { %1525 = vmatprep.subr.bf16.mxu0 %v1735_v0 }
 0x43d   : > { %v1964_v9 = vpop.f32.mrb[4].mxu0 }
 0x43e   : > { %v1477_v10 = vpop.f32.mrb[5].mxu0 }
 0x43f   : > { %v753_v11 = vpop.f32.mrb[6].mxu0  ;;  %v1617_v10 = vld [vmem:[%s2085_s5 + $0x28] sm:$0xff]  }
 0x440   : > { %v1478_v12 = vpop.f32.mrb[7].mxu0  ;;  %1526 = vmatpush3.bf16.msra.mxu0 %v1617_v10  ;;  %v1618_v11 = vld [vmem:[%s2085_s5 + $0x30] sm:$0xff]  }
 0x441   : > { %1527 = vmatprep.subr.bf16.mxu0 %v1735_v0 }
 0x444   : > { %1528 = vmatpush3.bf16.msra.mxu0 %v1618_v11 }
 0x445   : > { %v804_v13 = vpop.f32.mrb[8].mxu0  ;;  %1529 = vmatprep.subr.bf16.mxu0 %v1735_v0 }
 0x446   : > { %v1483_v14 = vpop.f32.mrb[9].mxu0  ;;  %v810_v15 = vsel %vm698_vm4, %v804_v13, -inf }
 0x447   : > { %811 = vmax.xlane.f32.xlu1 %v810_v15  ;;  %v807_v16 = vpop.f32.mrb[10].mxu0 }
 0x448   : > { %v1484_v17 = vpop.f32.mrb[11].mxu0 }
 0x44d   : > { %v915_v18 = vpop.f32.mrb[12].mxu0 }
 0x44e   : > { %v1495_v19 = vpop.f32.mrb[13].mxu0  ;;  %v921_v20 = vsel %vm698_vm4, %v915_v18, -inf }
 0x44f   : > { %922 = vmax.xlane.f32.xlu0 %v921_v20  ;;  %v918_v21 = vpop.f32.mrb[14].mxu0 }
 0x450   : > { %v1496_v22 = vpop.f32.mrb[15].mxu0 }
 0x455   : > { %v1025_v23 = vpop.f32.mrb[16].mxu0 }
 0x456   : > { %v1507_v24 = vpop.f32.mrb[17].mxu0  ;;  %v1031_v27 = vsel %vm698_vm4, %v1025_v23, -inf }
 0x457   : > { %v1028_v25 = vpop.f32.mrb[18].mxu0 }
 0x458   : > { %931 = vrot.lane.b32.xlu1 %v1935_v50, %s1738_s16  ;;  %v1508_v26 = vpop.f32.mrb[19].mxu0 }
 0x465   : > { %821 = vrot.lane.b32.xlu0 %v1935_v50, %s1737_s13 }
 0x47c   : > { %1032 = vmax.xlane.f32.xlu1 %v1031_v27 }
 0x48d   : > { %1041 = vrot.lane.b32.xlu1 %v1935_v50, %s1739_s18 }
 0x4d4   : > { %v812_v28 = vpop.xlane.xlu1 %811 }
 0x4d5   : > { %v813_v29 = vsub.f32 %v804_v13, %v812_v28  ;;  %v1619_v13 = vld [vmem:[%s2085_s5 + $0x38] sm:$0xff]  }
 0x4d6   : > { %1530 = vmatpush3.bf16.msra.mxu0 %v1619_v13 }
 0x4d7   : > { %v814_v30 = vmul.f32 1.442695, %v813_v29  ;;  %v1349_v29 = vld [vmem:[%s2086_s6] ss:$0 sm:$0xff] }
 0x4d8   : > { %v932_v37 = vpop.permute.xlu1 %931 }
 0x4d9   : > { %1622 = vpow2.f32 %v814_v30  ;;  %v937_v40 = vsel %vm712_vm3, %v932_v37, 0 }
 0x4dc   : > { %v923_v31 = vpop.xlane.xlu0 %922 }
 0x4dd   : > { %v924_v32 = vsub.f32 %v915_v18, %v923_v31 }
 0x4df   : > { %v925_v33 = vmul.f32 1.442695, %v924_v32 }
 0x4e0   : > { %v822_v34 = vpop.permute.xlu0 %821 }
 0x4e1   : > { %1624 = vpow2.f32 %v925_v33  ;;  %v827_v35 = vsel %vm712_vm3, %v822_v34, 0 }
 0x4e2   : > { %1486 = vmatpush3.bf16.msra.mxu1 %v827_v35 }
 0x4e3   : > { %v1623_v36 = vpop.eup %1622  ;;  %1497 = vmatprep.subr.bf16.mxu1 %v1735_v0 }
 0x4e4   : > { %v816_v38 = vsel %vm698_vm4, %v1623_v36, 0.0  ;;  %v819_v39 = vpack.c.bf16 %v1623_v36, %v1623_v36 }
 0x4e5   : > { %817 = vadd.xlane.f32.xlu0 %v816_v38 }
 0x4e6   : > { %1488 = vmatmul.mubr.msk.bf16.vlgmr.msra.gmra.mrb[16].mxu1 %vm698_vm4, %v819_v39 }
 0x4e7   : > { %1498 = vmatpush3.bf16.msra.mxu1 %v937_v40  ;;  %1499 = vmatprep.mubr.msk.bf16.mxu1 %vm1736_vm0, %v1735_v0 }
 0x4e8   : > { %1509 = vmatprep.subr.bf16.mxu1 %v1735_v0 }
 0x4eb   : > { %v1625_v41 = vpop.eup %1624 }
 0x4ec   : > { %v927_v42 = vsel %vm698_vm4, %v1625_v41, 0.0  ;;  %v930_v43 = vpack.c.bf16 %v1625_v41, %v1625_v41 }
 0x4ed   : > { %928 = vadd.xlane.f32.xlu1 %v927_v42 }
 0x4ee   : > { %1500 = vmatmul.mubr.msk.bf16.vlgmr.msra.gmra.mrb[20].mxu1 %vm698_vm4, %v930_v43 }
 0x4ef   : > { %1511 = vmatprep.mubr.msk.bf16.mxu1 %vm1736_vm0, %v1735_v0 }
 0x509   : > { %v1033_v44 = vpop.xlane.xlu1 %1032 }
 0x50a   : > { %v1034_v45 = vsub.f32 %v1025_v23, %v1033_v44 }
 0x50c   : > { %v1035_v46 = vmul.f32 1.442695, %v1034_v45 }
 0x50d   : > { %v1042_v47 = vpop.permute.xlu1 %1041 }
 0x50e   : > { %1626 = vpow2.f32 %v1035_v46  ;;  %v1047_v48 = vsel %vm712_vm3, %v1042_v47, 0 }
 0x50f   : > { %1510 = vmatpush3.bf16.msra.mxu1 %v1047_v48 }
 0x518   : > { %v1627_v49 = vpop.eup %1626 }
 0x519   : > { %v1037_v50 = vsel %vm698_vm4, %v1627_v49, 0.0  ;;  %v1040_v51 = vpack.c.bf16 %v1627_v49, %v1627_v49 }
 0x51a   : > { %1038 = vadd.xlane.f32.xlu0 %v1037_v50 }
 0x51b   : > { %1512 = vmatmul.mubr.msk.bf16.vlgmr.msra.gmra.mrb[24].mxu1 %vm698_vm4, %v1040_v51 }
 0x51e   : > { %706 = vadd.xlane.f32.xlu0 %v705_v52 }
 0x572   : > { %v818_v53 = vpop.xlane.xlu0 %817 }
 0x573   : > { %1628 = vrcp.f32 %v818_v53 }
 0x57a   : > { %v929_v54 = vpop.xlane.xlu1 %928 }
 0x57b   : > { %1630 = vrcp.f32 %v929_v54 }
 0x57d   : > { %v1629_v56 = vpop.eup %1628 }
 0x585   : > { %v1631_v1 = vpop.eup %1630 }
 0x5a7   : > { %v1039_v12 = vpop.xlane.xlu0 %1038 }
 0x5a8   : > { %1632 = vrcp.f32 %v1039_v12 }
 0x5ab   : > { %v707_v20 = vpop.xlane.xlu0 %706 }
 0x5ac   : > { %1634 = vrcp.f32 %v707_v20 }
 0x5b2   : > { %v1633_v14 = vpop.eup %1632 }
 0x5b6   : > { %v1635_v0 = vpop.eup %1634 }
 0x5b7   : > { %v757_v22 = vmul.f32 %v1635_v0, %v1964_v9 }
 0x5b9   : > { %v863_v57 = vpop.f32.mrb[16].mxu1 }
 0x5ba   : > { %v870_v59 = vmul.f32 %v1629_v56, %v863_v57  ;;  %v1489_v60 = vpop.f32.mrb[17].mxu1 }
 0x5bb   : > { %v866_v61 = vpop.f32.mrb[18].mxu1 }
 0x5bc   : > { %1092 = vrot.lane.b32.xlu1 %v870_v59, %s1739_s18  ;;  %v1490_v62 = vpop.f32.mrb[19].mxu1 }
 0x5c1   : > { %v973_v2 = vpop.f32.mrb[20].mxu1 }
 0x5c2   : > { %v980_v4 = vmul.f32 %v1631_v1, %v973_v2  ;;  %v1501_v5 = vpop.f32.mrb[21].mxu1 }
 0x5c3   : > { %v976_v6 = vpop.f32.mrb[22].mxu1 }
 0x5c4   : > { %1096 = vrot.lane.b32.xlu0 %v980_v4, %s1738_s16  ;;  %v1502_v7 = vpop.f32.mrb[23].mxu1  ;;  %s1668_s16 = sshll.u32 %s1740_s22, 4  ;;  %s1669_s16 = int_to_ptr.vmem [resolvable:$false] %s1668_s16 }
 0x5c5   : > { %s1670_s23 = scalar_lea.vmem %s1669_s16, 256 }
 0x5ee   : > { %v1083_v15 = vpop.f32.mrb[24].mxu1 }
 0x5ef   : > { %v1090_v16 = vmul.f32 %v1633_v14, %v1083_v15  ;;  %v1513_v17 = vpop.f32.mrb[25].mxu1 }
 0x5f0   : > { %v1086_v18 = vpop.f32.mrb[26].mxu1 }
 0x5f1   : > { %1100 = vrot.lane.b32.xlu1 %v1090_v16, %s1737_s13  ;;  %v1514_v19 = vpop.f32.mrb[27].mxu1  ;;  %s1311_s13 = sshll.u32 %s282_s29, 3 }
 0x5f2   : > { %s284_s17 = scalar_lea.vmem [#allocation5], %s1311_s13 }
 0x5f3   : > { %s1234_s15 = sshll.u32 %s284_s17, 4  ;;  %s2039_s15 = int_to_ptr.vmem [resolvable:$true] %s1234_s15 }
 0x5f4   : > { %s1664_s21 = scalar_lea.vmem %s2039_s15, 128  ;;  %p1671_p2 = scmp.lt.s32.totalorder %s2039_s15, %s1669_s16 }
 0x5f5   : > { %p1665_p6 = scmp.ne.s32.totalorder %s2039_s15, %s1664_s21  ;;  %p1672_p3 = scmp.lt.s32.totalorder %s1670_s23, %s1664_s21 }
 0x5f7   : > { %p1666_p10 = pnand %p1665_p6, %p2098_p9  ;;  %p1673_p4 = por %p1672_p3, %p1671_p2 }
 0x5f9   : > { %p1667_p12 = pneg %p1666_p10 }
 0x5fb   : > { %p1674_p7 = pnand %p1673_p4, %p1667_p12 }
 0x62e   : > { %v1093_v21 = vpop.permute.xlu1 %1092 }
 0x62f   : > { %v1103_v24 = vsel %vm315_vm1, %v757_v22, %v1093_v21 }
 0x636   : > { %v1097_v23 = vpop.permute.xlu0 %1096 }
 0x637   : > { %v1105_v25 = vsel %vm1104_vm5, %v1103_v24, %v1097_v23 }
 0x663   : > { %v1101_v26 = vpop.permute.xlu1 %1100 }
 0x664   : > { %v1106_v27 = vsel %vm415_vm2, %v1105_v25, %v1101_v26 }
 0x665   : > { %v1107_v28 = vpack.c.bf16 %v1106_v27, %v1106_v27 }
 0x667   : > { %1532 = vmatmul.mubr.bf16.vlgmr.msra.gmra.mrb[20].mxu0 %v1107_v28 }
 0x73a   : > { %v1213_v9 = vpop.f32.mrb[20].mxu0 }
 0x73b   : > { %v1214_v30 = vadd.f32 %v1349_v29, %v1213_v9  ;;  %v1533_v31 = vpop.f32.mrb[21].mxu0 }
 0x73c   : > { %v1216_v32 = vpop.f32.mrb[22].mxu0 }
 0x73d   : > { %v1534_v33 = vpop.f32.mrb[23].mxu0  ;;  %1219 = vst.msk [vmem:[%s284_s17] sm:$0xff] %vm315_vm1, %v1214_v30 }
 0x73e   : > { %1677 = shalt.err (!%p1674_p7)
}
 0x73f   : > { %s1678_s29 = scalar_lea.hbm %s2037_s20, 128  ;;  %s1682_s9 = scalar_lea.hbm %s2087_s7, 256 }
 0x740   : > { %p1679_p8 = scmp.ne.s32.totalorder %s2037_s20, %s1678_s29  ;;  %p1683_p1 = scmp.lt.u32.totalorder %s2037_s20, %s2087_s7 }
 0x741   : > { %p1684_p0 = scmp.lt.u32.totalorder %s1682_s9, %s1678_s29  ;;  %p1686_p6 = scmp.lt.u32.totalorder %s1678_s29, %s2037_s20 }
 0x742   : > { %p1680_p11 = pnand %p1679_p8, %p2098_p9 }
 0x743   : > { %p1685_p5 = por %p1684_p0, %p1683_p1 }
 0x744   : > { %p1681_p13 = pneg %p1680_p11 }
 0x745   : > { %p1687_p10 = por %p1686_p6, %p1685_p5 }
 0x747   : > { %p1688_p12 = pnand %p1687_p10, %p1681_p13 }
 0x749   : > { %1691 = shalt.err (!%p1688_p12)
}
 0x74a   : > { %1539 = dma.vmem_to_hbm [thread:$0]  (%p2098_p9), %s2039_s15, 128, %s2037_s20, %s1221_s28  }
 0x74b PF: > { %p1551_p2 = scmp.ge.s32.totalorder %s1730_s27, 2  ;;  %s1246_s18 = sand.u32 1, %s1718_s24  }
 0x74c   : > { %p2099_p3 = scmp.ne.s32.totalorder %s2092_s12, 0  ;;  %s1247_s19 = scalar_lea.sflag [#allocation4], %s1246_s18 }
 0x74e   : > { %p1546_p4 = pnand %p1551_p2, %p2099_p3 }
 0x750   : > { %1713 = dma.done.wait (!%p1546_p4), %s1247_s19, 128  }
 0x751   : > { %1715 = vsyncadd (!%p1546_p4), %s1247_s19, 4294967168  ;;  %p18_p7 = scmp.ge.s32.totalorder %s1806_s30, 4   ;;  %s2100_s24 = smov %s1722_s25 }
 0x752   : > { %s2101_s25 = smov %s1726_s26  ;;  %s2102_s26 = smov %s1817_s10 }
 0x753   : > { %s2103_s27 = smov %s1806_s30  ;;  %20 = sbr.rel (!%p18_p7) target bundleno = 4 (0x4), region = 88 }
 0x75a   :  { %1252 = vsyncpa [#allocation3], 1 }
 0x75b   :  { %1254 = vsyncpa [#allocation3 + $0x1], 1 }
 0x75c   :  { %1255 = vsyncpa [#allocation4], 1 }
 0x75d   :  { %1257 = vsyncpa [#allocation4 + $0x1], 1 }

</bundles_post_ra>
